<compile_context>
chip_gen: v7x
topology: tpu7x:2x2x1
jax: 0.10.0
libtpu: 0.0.40
codegen_flags: <defaults>
</compile_context>

<pallas_src>
import functools

import jax
import jax.numpy as jnp
from jax.experimental import pallas as pl
from jax.experimental.pallas import tpu as pltpu

LANES = 128  # lane width of a vreg / padded feature width used everywhere

DATA_SCHEMA = {
    "sensor": {"type": "dense", "dimension": 16},
    "grid": {"type": "spatial", "resolution": {"x": 8, "y": 8}},
}

NET_SCHEMA = {
    "branches": [
        {
            "key": "sensor",
            "activation": "ReLU",
            "layers": [("FC", 32), ("FC", 8), ("FC", 32)],
            "regLayerID": 1,
            "codeLayerID": 1,
        },
        {
            "key": "grid",
            "activation": "LeakyReLU",
            "layers": [("FC", 32), ("FC", 8), ("FC", 32)],
            "regLayerID": 1,
            "codeLayerID": 1,
        },
    ],
    "regressor": {"activation": "ReLU", "layers": [("FC", 32), ("FC", 16)]},
}


# ----------------------------------------------------------------------------
# Schema -> static "plan" (mirrors DENet.__init__ layer construction exactly)
# ----------------------------------------------------------------------------
def build_plan(data_schema, net_schema):
    dims, branches, out_shapes = [], [], []
    for b in net_schema["branches"]:
        ds = data_schema[b["key"]]
        if ds["type"] == "spatial":
            in_size = ds["resolution"]["x"] + ds["resolution"]["y"]
        else:
            in_size = ds["dimension"]
        dims.append(in_size)

        layer_dims = [shape for (_, shape) in b["layers"]]
        reg_id = b["regLayerID"]
        enc, dec = [], []
        prev = in_size
        for i, out in enumerate(layer_dims):
            (enc if i <= reg_id else dec).append((prev, out, b["activation"]))
            prev = out
        # final reconstruction layer: Linear(last, in_size) + Sigmoid
        dec.append((prev, in_size, "Sigmoid"))
        out_shapes.append(layer_dims[reg_id])
        branches.append({"enc": tuple(enc), "dec": tuple(dec)})

    reg = net_schema["regressor"]
    reg_layers = []
    prev = sum(out_shapes)
    for (_, out) in reg["layers"]:
        reg_layers.append((prev, out, reg["activation"]))
        prev = out
    reg_layers.append((prev, 1, None))  # final Linear(..., 1), no activation
    return tuple(dims), tuple(branches), tuple(reg_layers)


DIMS, BRANCHES, REG_LAYERS = build_plan(DATA_SCHEMA, NET_SCHEMA)
TOTAL_IN = sum(DIMS)  # 32

# Packed weight-buffer row layout (all offsets are multiples of 8):
#   L1: fused encoder layer 1   (K = TOTAL_IN = 32 rows)
#   L2: fused encoder layer 2   (K = 128 padded)
#   L3: fused decoder layer 1   (K = 128 padded)
#   L4: fused reconstruction    (K = 128 padded)
#   R1, R2, R3: regressor       (K = 128 padded)
_W_ROW_SIZES = [("L1", TOTAL_IN), ("L2", LANES), ("L3", LANES), ("L4", LANES),
                ("R1", LANES), ("R2", LANES), ("R3", LANES)]
W_OFF = {}
_o = 0
for _name, _rows in _W_ROW_SIZES:
    W_OFF[_name] = _o
    _o += _rows
W_TOTAL_ROWS = _o                      # 800
W_ROWS = dict(_W_ROW_SIZES)
BIAS_ROW = {"L1": 0, "L2": 1, "L3": 2, "L4": 3, "R1": 4, "R2": 5, "R3": 6}
B_TOTAL_ROWS = 8                       # 7 bias rows, padded to a sublane tile


# ----------------------------------------------------------------------------
# Deterministic parameter init (Linear: U(-1/sqrt(fan_in), 1/sqrt(fan_in)))
# ----------------------------------------------------------------------------
def init_params(key, branches, reg_layers):
    params = []

    def linear(k, fan_in, fan_out):
        k1, k2 = jax.random.split(k)
        bound = 1.0 / (fan_in ** 0.5)
        w = jax.random.uniform(k1, (fan_in, fan_out), jnp.float32, -bound, bound)
        b = jax.random.uniform(k2, (1, fan_out), jnp.float32, -bound, bound)
        return w, b

    for br in branches:
        for (fin, fout, _) in br["enc"] + br["dec"]:
            key, sub = jax.random.split(key)
            w, b = linear(sub, fin, fout)
            params += [w, b]
    for (fin, fout, _) in reg_layers:
        key, sub = jax.random.split(key)
        w, b = linear(sub, fin, fout)
        params += [w, b]
    return params


# ----------------------------------------------------------------------------
# Wrapper-side packing: block-diagonal fused weights in two lane-dense slabs.
# (Specialized to the synthetic schema: 2 branches with identical layer shapes.)
# ----------------------------------------------------------------------------
def pack_fused_params(params):
    p = [jnp.asarray(a, jnp.float32) for a in params]

    def wb(i):  # i-th Linear in the original parameter order
        return p[2 * i], p[2 * i + 1]

    # branch 0: enc1, enc2, dec1, dec2 ; branch 1: same ; regressor: r1, r2, r3
    (we1_0, be1_0), (we2_0, be2_0), (wd1_0, bd1_0), (wd2_0, bd2_0) = \
        wb(0), wb(1), wb(2), wb(3)
    (we1_1, be1_1), (we2_1, be2_1), (wd1_1, bd1_1), (wd2_1, bd2_1) = \
        wb(4), wb(5), wb(6), wb(7)
    (wr1, br1), (wr2, br2), (wr3, br3) = wb(8), wb(9), wb(10)

    w_packed = jnp.zeros((W_TOTAL_ROWS, LANES), jnp.float32)
    b_packed = jnp.zeros((B_TOTAL_ROWS, LANES), jnp.float32)

    def place_w(buf, name, blocks):
        off = W_OFF[name]
        for r, c, w in blocks:
            buf = buf.at[off + r: off + r + w.shape[0], c: c + w.shape[1]].set(w)
        return buf

    def place_b(buf, name, pieces):
        row = BIAS_ROW[name]
        for c, b in pieces:
            buf = buf.at[row, c: c + b.shape[1]].set(b[0])
        return buf

    # Fused layer column layout:
    #   L1/L3 outputs: branch0 -> lanes [0,32), branch1 -> [32,64)
    #   L2 output (code): branch0 -> [0,8), branch1 -> [8,16)  (== merged code)
    #   L4 output (recon): branch0 -> [0,16), branch1 -> [16,32)
    #   regressor output placed at lane 32 (== TOTAL_IN) so the combined output
    #   slab is [recon0 | recon1 | reg | zero padding].
    w_packed = place_w(w_packed, "L1", [(0, 0, we1_0), (16, 32, we1_1)])
    w_packed = place_w(w_packed, "L2", [(0, 0, we2_0), (32, 8, we2_1)])
    w_packed = place_w(w_packed, "L3", [(0, 0, wd1_0), (8, 32, wd1_1)])
    w_packed = place_w(w_packed, "L4", [(0, 0, wd2_0), (32, 16, wd2_1)])
    w_packed = place_w(w_packed, "R1", [(0, 0, wr1)])
    w_packed = place_w(w_packed, "R2", [(0, 0, wr2)])
    w_packed = place_w(w_packed, "R3", [(0, TOTAL_IN, wr3)])

    b_packed = place_b(b_packed, "L1", [(0, be1_0), (32, be1_1)])
    b_packed = place_b(b_packed, "L2", [(0, be2_0), (8, be2_1)])
    b_packed = place_b(b_packed, "L3", [(0, bd1_0), (32, bd1_1)])
    b_packed = place_b(b_packed, "L4", [(0, bd2_0), (16, bd2_1)])
    b_packed = place_b(b_packed, "R1", [(0, br1)])
    b_packed = place_b(b_packed, "R2", [(0, br2)])
    b_packed = place_b(b_packed, "R3", [(TOTAL_IN, br3)])

    return w_packed, b_packed


# ----------------------------------------------------------------------------
# Fused Pallas kernel: one batch tile, all layers, lane-dense 128-wide output.
# ----------------------------------------------------------------------------
def _fused_kernel(x_ref, w_ref, b_ref, out_ref):
    x = x_ref[...]                                           # (TILE_B, 32)
    lane = jax.lax.broadcasted_iota(jnp.int32, (1, LANES), 1)

    def slopes(n_relu, n_total):
        # per-lane negative slope: 0.0 (ReLU) on [0, n_relu), 0.1 (LeakyReLU)
        # on [n_relu, n_total), 0.0 on padding lanes (act(0) == 0 either way).
        return jnp.where((lane >= n_relu) & (lane < n_total),
                         jnp.float32(0.1), jnp.float32(0.0))

    def leaky(v, s):
        return jnp.where(v >= 0.0, v, v * s)

    def layer(h, name):
        w = w_ref[W_OFF[name]: W_OFF[name] + W_ROWS[name], :]
        b = b_ref[BIAS_ROW[name]: BIAS_ROW[name] + 1, :]
        return jnp.dot(h, w, preferred_element_type=jnp.float32) + b

    # fused branch encoders (branch0: ReLU lanes, branch1: LeakyReLU lanes)
    h = leaky(layer(x, "L1"), slopes(32, 64))                # valid lanes [0,64)
    code = leaky(layer(h, "L2"), slopes(8, 16))              # merged code [0,16)

    # fused branch decoders -> reconstructions in lanes [0,32)
    d = leaky(layer(code, "L3"), slopes(32, 64))
    recon = jax.nn.sigmoid(layer(d, "L4"))

    # regressor on the merged code; final weight places the value at lane 32
    r = jnp.maximum(layer(code, "R1"), 0.0)
    r = jnp.maximum(layer(r, "R2"), 0.0)
    r = layer(r, "R3")                                       # value at lane 32, zeros elsewhere

    # single lane-dense store: [recon0 | recon1 | regressor | zeros]
    out_ref[...] = jnp.where(lane < TOTAL_IN, recon, r)


def _choose_tile(batch):
    if batch >= 512:
        return 512                      # multiple of 128/256: MXU-friendly on all gens
    return max(8, ((batch + 7) // 8) * 8)


def denet_forward(x, params, tile_b=None):
    x = jnp.asarray(x, jnp.float32)
    batch = x.shape[0]
    w_packed, b_packed = pack_fused_params(params)

    if tile_b is None:
        tile_b = _choose_tile(batch)
    tile_b = max(8, (tile_b // 8) * 8)
    padded = ((batch + tile_b - 1) // tile_b) * tile_b
    if padded != batch:
        x = jnp.pad(x, ((0, padded - batch), (0, 0)))
    grid = (padded // tile_b,)

    cost = pl.CostEstimate(
        flops=2 * padded * (TOTAL_IN * LANES + 6 * LANES * LANES),
        transcendentals=padded * LANES,                       # sigmoid on recon tile
        bytes_accessed=padded * (TOTAL_IN + LANES) * 4
        + (W_TOTAL_ROWS + B_TOTAL_ROWS) * LANES * 4,
    )

    out = pl.pallas_call(
        _fused_kernel,
        out_shape=jax.ShapeDtypeStruct((padded, LANES), jnp.float32),
        grid=grid,
        in_specs=[
            pl.BlockSpec((tile_b, TOTAL_IN), lambda i: (i, 0)),     # x: tiled over batch
            pl.BlockSpec((W_TOTAL_ROWS, LANES), lambda i: (0, 0)),  # weights: resident
            pl.BlockSpec((B_TOTAL_ROWS, LANES), lambda i: (0, 0)),  # biases: resident
        ],
        out_specs=pl.BlockSpec((tile_b, LANES), lambda i: (i, 0)),
        compiler_params=pltpu.CompilerParams(
            dimension_semantics=("parallel",),
            vmem_limit_bytes=32 * 1024 * 1024,
        ),
        cost_estimate=cost,
    )(x, w_packed, b_packed)

    out_ae = []
    off = 0
    for d in DIMS:
        out_ae.append(out[:batch, off: off + d])
        off += d
    out_regressor = out[:batch, TOTAL_IN: TOTAL_IN + 1]
    return out_ae, out_regressor


# ----------------------------------------------------------------------------
# Pure-JAX reference (unfused, original per-branch math) for correctness check.
# ----------------------------------------------------------------------------
def _apply_act(v, act):
    if act == "ReLU":
        return jnp.maximum(v, 0.0)
    if act == "LeakyReLU":
        return jnp.where(v >= 0, v, 0.1 * v)   # module uses negative_slope=0.1
    if act == "Sigmoid":
        return jax.nn.sigmoid(v)
    if act is None:
        return v
    raise ValueError(f"unsupported activation {act}")


def denet_reference(x, params):
    pi = [0]

    def next_linear(h):
        w, b = params[pi[0]], params[pi[0] + 1]
        pi[0] += 2
        return jnp.dot(h, w, precision=jax.lax.Precision.HIGHEST) + b

    codes, out_ae = [], []
    start = 0
    for bi in range(len(BRANCHES)):
        h = x[:, start: start + DIMS[bi]]
        start += DIMS[bi]
        for (_, _, act) in BRANCHES[bi]["enc"]:
            h = _apply_act(next_linear(h), act)
        codes.append(h)
        d = h
        for (_, _, act) in BRANCHES[bi]["dec"]:
            d = _apply_act(next_linear(d), act)
        out_ae.append(d)
    r = jnp.concatenate(codes, axis=1)
    for (_, _, act) in REG_LAYERS:
        r = _apply_act(next_linear(r), act)
    return out_ae, r


if __name__ == "__main__":
    key = jax.random.PRNGKey(0)
    kx, kp = jax.random.split(key)

    # batch=20 with tile_b=8 exercises the batch grid (3 tiles) + padding path.
    batch = 20
    x = jax.random.normal(kx, (batch, TOTAL_IN), dtype=jnp.float32)
    params = init_params(kp, BRANCHES, REG_LAYERS)

    out_ae, out_regressor = denet_forward(x, params, tile_b=8)
    out_ae = [jax.block_until_ready(o) for o in out_ae]
    out_regressor = jax.block_until_ready(out_regressor)

    ref_ae, ref_reg = denet_reference(x, params)
    for a, b in zip(out_ae, ref_ae):
        assert a.shape == b.shape
        assert float(jnp.max(jnp.abs(a - b))) < 1e-4
    assert out_regressor.shape == (batch, 1)
    assert float(jnp.max(jnp.abs(out_regressor - ref_reg))) < 1e-4

    print("KERNEL_OK")
</pallas_src>

<mosaic_0001>
module attributes {stable_mosaic.version = 11 : i64} {
  func.func @_fused_kernel(%arg0: i32, %arg1: memref<8x32xf32, #tpu.memory_space<vmem>>, %arg2: memref<800x128xf32, #tpu.memory_space<vmem>>, %arg3: memref<8x128xf32, #tpu.memory_space<vmem>>, %arg4: memref<8x128xf32, #tpu.memory_space<vmem>>) attributes {dimension_semantics = [#tpu.dimension_semantics<parallel>], iteration_bounds = array<i64: 3>, scalar_prefetch = 0 : i64, scratch_operands = 0 : i64, tpu.core_type = #tpu.core_type<tc>, window_params = [{transform_indices = @transform_0, window_bounds = array<i64: 8, 32>}, {pipeline_mode = #tpu.pipeline_mode<synchronous>, transform_indices = @transform_1, window_bounds = array<i64: 800, 128>}, {pipeline_mode = #tpu.pipeline_mode<synchronous>, transform_indices = @transform_2, window_bounds = array<i64: 8, 128>}, {transform_indices = @transform_3, window_bounds = array<i64: 8, 128>}]} {
    %c0 = arith.constant 0 : index
    %c0_0 = arith.constant 0 : index
    %0 = vector.load %arg1[%c0, %c0_0] : memref<8x32xf32, #tpu.memory_space<vmem>>, vector<8x32xf32>
    %1 = tpu.iota {dimensions = array<i32: 1>} : vector<1x128xi32>
    %c0_1 = arith.constant 0 : index
    %c0_2 = arith.constant 0 : index
    %2 = vector.load %arg2[%c0_1, %c0_2] : memref<800x128xf32, #tpu.memory_space<vmem>>, vector<32x128xf32>
    %c0_3 = arith.constant 0 : index
    %c0_4 = arith.constant 0 : index
    %3 = vector.load %arg3[%c0_3, %c0_4] : memref<8x128xf32, #tpu.memory_space<vmem>>, vector<1x128xf32>
    %cst = arith.constant dense<0.000000e+00> : vector<8x128xf32>
    %4 = tpu.matmul %0, %2, %cst {dimension_numbers = #tpu.dot_dimension_numbers<[1], [0], [0], [1], [0, 0, 1, 1], [], []>} : vector<8x32xf32>, vector<32x128xf32>, vector<8x128xf32> -> vector<8x128xf32>
    %5 = vector.broadcast %3 : vector<1x128xf32> to vector<8x128xf32>
    %6 = arith.addf %4, %5 : vector<8x128xf32>
    %c32_i32 = arith.constant 32 : i32
    %7 = vector.broadcast %c32_i32 : i32 to vector<1x128xi32>
    %8 = arith.cmpi sge, %1, %7 : vector<1x128xi32>
    %c64_i32 = arith.constant 64 : i32
    %9 = vector.broadcast %c64_i32 : i32 to vector<1x128xi32>
    %10 = arith.cmpi slt, %1, %9 : vector<1x128xi32>
    %11 = arith.andi %8, %10 : vector<1x128xi1>
    %cst_5 = arith.constant 1.000000e-01 : f32
    %cst_6 = arith.constant 0.000000e+00 : f32
    %12 = vector.broadcast %cst_5 : f32 to vector<1x128xf32>
    %13 = vector.broadcast %cst_6 : f32 to vector<1x128xf32>
    %14 = arith.select %11, %12, %13 : vector<1x128xi1>, vector<1x128xf32>
    %cst_7 = arith.constant 0.000000e+00 : f32
    %15 = vector.broadcast %cst_7 : f32 to vector<8x128xf32>
    %16 = arith.cmpf oge, %6, %15 : vector<8x128xf32>
    %17 = vector.broadcast %14 : vector<1x128xf32> to vector<8x128xf32>
    %18 = arith.mulf %6, %17 : vector<8x128xf32>
    %19 = arith.select %16, %6, %18 : vector<8x128xi1>, vector<8x128xf32>
    %c32 = arith.constant 32 : index
    %c0_8 = arith.constant 0 : index
    %20 = vector.load %arg2[%c32, %c0_8] : memref<800x128xf32, #tpu.memory_space<vmem>>, vector<128x128xf32>
    %c1 = arith.constant 1 : index
    %c0_9 = arith.constant 0 : index
    %21 = vector.load %arg3[%c1, %c0_9] : memref<8x128xf32, #tpu.memory_space<vmem>>, vector<1x128xf32>
    %cst_10 = arith.constant dense<0.000000e+00> : vector<8x128xf32>
    %22 = tpu.matmul %19, %20, %cst_10 {dimension_numbers = #tpu.dot_dimension_numbers<[1], [0], [0], [1], [0, 0, 1, 1], [], []>} : vector<8x128xf32>, vector<128x128xf32>, vector<8x128xf32> -> vector<8x128xf32>
    %23 = vector.broadcast %21 : vector<1x128xf32> to vector<8x128xf32>
    %24 = arith.addf %22, %23 : vector<8x128xf32>
    %c8_i32 = arith.constant 8 : i32
    %25 = vector.broadcast %c8_i32 : i32 to vector<1x128xi32>
    %26 = arith.cmpi sge, %1, %25 : vector<1x128xi32>
    %c16_i32 = arith.constant 16 : i32
    %27 = vector.broadcast %c16_i32 : i32 to vector<1x128xi32>
    %28 = arith.cmpi slt, %1, %27 : vector<1x128xi32>
    %29 = arith.andi %26, %28 : vector<1x128xi1>
    %cst_11 = arith.constant 1.000000e-01 : f32
    %cst_12 = arith.constant 0.000000e+00 : f32
    %30 = vector.broadcast %cst_11 : f32 to vector<1x128xf32>
    %31 = vector.broadcast %cst_12 : f32 to vector<1x128xf32>
    %32 = arith.select %29, %30, %31 : vector<1x128xi1>, vector<1x128xf32>
    %cst_13 = arith.constant 0.000000e+00 : f32
    %33 = vector.broadcast %cst_13 : f32 to vector<8x128xf32>
    %34 = arith.cmpf oge, %24, %33 : vector<8x128xf32>
    %35 = vector.broadcast %32 : vector<1x128xf32> to vector<8x128xf32>
    %36 = arith.mulf %24, %35 : vector<8x128xf32>
    %37 = arith.select %34, %24, %36 : vector<8x128xi1>, vector<8x128xf32>
    %c160 = arith.constant 160 : index
    %c0_14 = arith.constant 0 : index
    %38 = vector.load %arg2[%c160, %c0_14] : memref<800x128xf32, #tpu.memory_space<vmem>>, vector<128x128xf32>
    %c2 = arith.constant 2 : index
    %c0_15 = arith.constant 0 : index
    %39 = vector.load %arg3[%c2, %c0_15] : memref<8x128xf32, #tpu.memory_space<vmem>>, vector<1x128xf32>
    %cst_16 = arith.constant dense<0.000000e+00> : vector<8x128xf32>
    %40 = tpu.matmul %37, %38, %cst_16 {dimension_numbers = #tpu.dot_dimension_numbers<[1], [0], [0], [1], [0, 0, 1, 1], [], []>} : vector<8x128xf32>, vector<128x128xf32>, vector<8x128xf32> -> vector<8x128xf32>
    %41 = vector.broadcast %39 : vector<1x128xf32> to vector<8x128xf32>
    %42 = arith.addf %40, %41 : vector<8x128xf32>
    %c32_i32_17 = arith.constant 32 : i32
    %43 = vector.broadcast %c32_i32_17 : i32 to vector<1x128xi32>
    %44 = arith.cmpi sge, %1, %43 : vector<1x128xi32>
    %c64_i32_18 = arith.constant 64 : i32
    %45 = vector.broadcast %c64_i32_18 : i32 to vector<1x128xi32>
    %46 = arith.cmpi slt, %1, %45 : vector<1x128xi32>
    %47 = arith.andi %44, %46 : vector<1x128xi1>
    %cst_19 = arith.constant 1.000000e-01 : f32
    %cst_20 = arith.constant 0.000000e+00 : f32
    %48 = vector.broadcast %cst_19 : f32 to vector<1x128xf32>
    %49 = vector.broadcast %cst_20 : f32 to vector<1x128xf32>
    %50 = arith.select %47, %48, %49 : vector<1x128xi1>, vector<1x128xf32>
    %cst_21 = arith.constant 0.000000e+00 : f32
    %51 = vector.broadcast %cst_21 : f32 to vector<8x128xf32>
    %52 = arith.cmpf oge, %42, %51 : vector<8x128xf32>
    %53 = vector.broadcast %50 : vector<1x128xf32> to vector<8x128xf32>
    %54 = arith.mulf %42, %53 : vector<8x128xf32>
    %55 = arith.select %52, %42, %54 : vector<8x128xi1>, vector<8x128xf32>
    %c288 = arith.constant 288 : index
    %c0_22 = arith.constant 0 : index
    %56 = vector.load %arg2[%c288, %c0_22] : memref<800x128xf32, #tpu.memory_space<vmem>>, vector<128x128xf32>
    %c3 = arith.constant 3 : index
    %c0_23 = arith.constant 0 : index
    %57 = vector.load %arg3[%c3, %c0_23] : memref<8x128xf32, #tpu.memory_space<vmem>>, vector<1x128xf32>
    %cst_24 = arith.constant dense<0.000000e+00> : vector<8x128xf32>
    %58 = tpu.matmul %55, %56, %cst_24 {dimension_numbers = #tpu.dot_dimension_numbers<[1], [0], [0], [1], [0, 0, 1, 1], [], []>} : vector<8x128xf32>, vector<128x128xf32>, vector<8x128xf32> -> vector<8x128xf32>
    %59 = vector.broadcast %57 : vector<1x128xf32> to vector<8x128xf32>
    %60 = arith.addf %58, %59 : vector<8x128xf32>
    %61 = arith.negf %60 : vector<8x128xf32>
    %62 = math.exp %61 : vector<8x128xf32>
    %cst_25 = arith.constant 1.000000e+00 : f32
    %63 = vector.broadcast %cst_25 : f32 to vector<8x128xf32>
    %64 = arith.addf %63, %62 : vector<8x128xf32>
    %65 = arith.divf %63, %64 : vector<8x128xf32>
    %c416 = arith.constant 416 : index
    %c0_26 = arith.constant 0 : index
    %66 = vector.load %arg2[%c416, %c0_26] : memref<800x128xf32, #tpu.memory_space<vmem>>, vector<128x128xf32>
    %c4 = arith.constant 4 : index
    %c0_27 = arith.constant 0 : index
    %67 = vector.load %arg3[%c4, %c0_27] : memref<8x128xf32, #tpu.memory_space<vmem>>, vector<1x128xf32>
    %cst_28 = arith.constant dense<0.000000e+00> : vector<8x128xf32>
    %68 = tpu.matmul %37, %66, %cst_28 {dimension_numbers = #tpu.dot_dimension_numbers<[1], [0], [0], [1], [0, 0, 1, 1], [], []>} : vector<8x128xf32>, vector<128x128xf32>, vector<8x128xf32> -> vector<8x128xf32>
    %69 = vector.broadcast %67 : vector<1x128xf32> to vector<8x128xf32>
    %70 = arith.addf %68, %69 : vector<8x128xf32>
    %cst_29 = arith.constant 0.000000e+00 : f32
    %71 = vector.broadcast %cst_29 : f32 to vector<8x128xf32>
    %72 = arith.maximumf %70, %71 : vector<8x128xf32>
    %c544 = arith.constant 544 : index
    %c0_30 = arith.constant 0 : index
    %73 = vector.load %arg2[%c544, %c0_30] : memref<800x128xf32, #tpu.memory_space<vmem>>, vector<128x128xf32>
    %c5 = arith.constant 5 : index
    %c0_31 = arith.constant 0 : index
    %74 = vector.load %arg3[%c5, %c0_31] : memref<8x128xf32, #tpu.memory_space<vmem>>, vector<1x128xf32>
    %cst_32 = arith.constant dense<0.000000e+00> : vector<8x128xf32>
    %75 = tpu.matmul %72, %73, %cst_32 {dimension_numbers = #tpu.dot_dimension_numbers<[1], [0], [0], [1], [0, 0, 1, 1], [], []>} : vector<8x128xf32>, vector<128x128xf32>, vector<8x128xf32> -> vector<8x128xf32>
    %76 = vector.broadcast %74 : vector<1x128xf32> to vector<8x128xf32>
    %77 = arith.addf %75, %76 : vector<8x128xf32>
    %cst_33 = arith.constant 0.000000e+00 : f32
    %78 = vector.broadcast %cst_33 : f32 to vector<8x128xf32>
    %79 = arith.maximumf %77, %78 : vector<8x128xf32>
    %c672 = arith.constant 672 : index
    %c0_34 = arith.constant 0 : index
    %80 = vector.load %arg2[%c672, %c0_34] : memref<800x128xf32, #tpu.memory_space<vmem>>, vector<128x128xf32>
    %c6 = arith.constant 6 : index
    %c0_35 = arith.constant 0 : index
    %81 = vector.load %arg3[%c6, %c0_35] : memref<8x128xf32, #tpu.memory_space<vmem>>, vector<1x128xf32>
    %cst_36 = arith.constant dense<0.000000e+00> : vector<8x128xf32>
    %82 = tpu.matmul %79, %80, %cst_36 {dimension_numbers = #tpu.dot_dimension_numbers<[1], [0], [0], [1], [0, 0, 1, 1], [], []>} : vector<8x128xf32>, vector<128x128xf32>, vector<8x128xf32> -> vector<8x128xf32>
    %83 = vector.broadcast %81 : vector<1x128xf32> to vector<8x128xf32>
    %84 = arith.addf %82, %83 : vector<8x128xf32>
    %c32_i32_37 = arith.constant 32 : i32
    %85 = vector.broadcast %c32_i32_37 : i32 to vector<1x128xi32>
    %86 = arith.cmpi slt, %1, %85 : vector<1x128xi32>
    %87 = vector.shape_cast %86 : vector<1x128xi1> to vector<1x128xi1>
    %88 = vector.broadcast %87 : vector<1x128xi1> to vector<8x128xi1>
    %89 = arith.select %88, %65, %84 : vector<8x128xi1>, vector<8x128xf32>
    %c0_38 = arith.constant 0 : index
    %c0_39 = arith.constant 0 : index
    %90 = vector.load %arg4[%c0_38, %c0_39] : memref<8x128xf32, #tpu.memory_space<vmem>>, vector<8x128xf32>
    tpu.vector_store %arg4[%c0_38, %c0_39], %89 {strides = array<i32>} : memref<8x128xf32, #tpu.memory_space<vmem>>, vector<8x128xf32>,
    return
  }
  func.func @transform_0(%arg0: i32) -> (i32, i32) {
    %c0_i32 = arith.constant 0 : i32
    %c0_i32_0 = arith.constant 0 : i32
    return %arg0, %c0_i32 : i32, i32
  }
  func.func @transform_1(%arg0: i32) -> (i32, i32) {
    %c0_i32 = arith.constant 0 : i32
    %c0_i32_0 = arith.constant 0 : i32
    %c0_i32_1 = arith.constant 0 : i32
    return %c0_i32, %c0_i32_0 : i32, i32
  }
  func.func @transform_2(%arg0: i32) -> (i32, i32) {
    %c0_i32 = arith.constant 0 : i32
    %c0_i32_0 = arith.constant 0 : i32
    %c0_i32_1 = arith.constant 0 : i32
    return %c0_i32, %c0_i32_0 : i32, i32
  }
  func.func @transform_3(%arg0: i32) -> (i32, i32) {
    %c0_i32 = arith.constant 0 : i32
    %c0_i32_0 = arith.constant 0 : i32
    return %arg0, %c0_i32 : i32, i32
  }
}

</mosaic_0001>

<bundles_post_ra>
// kernel: tpu_custom_call.1
= control target key start
LH: loop header
LB: loop body
LE: loop exit
PB: predicated region body
PF: predicated region fallthrough
CT: control target
= control target key end

     0   :  { %8 = vsyncpa [#allocation3], 0  ;;  %s2048_s0 = inlined_call_operand.hbm [shape: f32[24,32], index: 0, kind: input, shape index: {}]   ;;  %s2049_s1 = inlined_call_operand.hbm [shape: f32[800,128], index: 1, kind: input, shape index: {}]   ;;  %s2050_s2 = inlined_call_operand.hbm [shape: f32[8,128], index: 2, kind: input, shape index: {}]   ;;  %s2051_s3 = inlined_call_operand.hbm [shape: f32[24,128], index: 3, kind: output, shape index: {}]  }
   0x1   :  { %10 = vsyncpa [#allocation3 + $0x1], 0 }
   0x2   :  { %11 = vsyncpa [#allocation6], 0 }
   0x3   :  { %12 = vsyncpa [#allocation4], 0 }
   0x4   :  { %14 = vsyncpa [#allocation4 + $0x1], 0  ;;  %s1744_s12 = smov 0   ;;  %s1746_s13 = smov 0  }
   0x5   :  { %s1748_s14 = smov 0   ;;  %s1750_s15 = smov 0  }
   0x6 LB: > { %s1765_s16 = sadd.s32 4294967295, %s1713_s15   ;;  %s978_s17 = sadd.s32 4294967294, %s1713_s15   ;;  %s1713_s15 = sphi %s1750_s15, %s2070_s15   ;;  %s1709_s14 = sphi %s1748_s14, %s2069_s14   ;;  %s1705_s13 = sphi %s1746_s13, %s2068_s13   ;;  %s1701_s12 = sphi %s1744_s12, %s2067_s12  }
   0x7   : > { %p40_p0 = scmp.ne.s32.totalorder %s1705_s13, %s1701_s12  ;;  %p2052_p1 = scmp.eq.s32.totalorder %s1765_s16, 0 }
   0x8   : > { %p112_p3 = scmp.eq.s32.totalorder %s978_s17, 2  ;;  %p979_p5 = scmp.ge.s32.totalorder %s1713_s15, 1 }
   0x9   : > { %p1774_p4 = por %p2052_p1, %p40_p0  ;;  %p119_p7 = scmp.lt.s32.totalorder %s1713_s15, 4 }
   0xa   : > { %p1779_p6 = por %p112_p3, %p40_p0  ;;  %s1715_s21 = smov [#allocation5]  }
   0xb   : > { %s2055_s18 = scalar_select %p1774_p4, 1, 0 }
   0xc   : > { %s2056_s19 = scalar_select %p1779_p6, 1, 0 }
   0xd   : > { %p1784_p8 = pnand %p979_p5, %p119_p7  ;;  %s131_s22 = sshll.u32 %s1715_s21, 4  ;;  %s132_s22 = int_to_ptr.vmem [resolvable:$true] %s131_s22 }
   0xe   : > { %s1716_s24 = smov [#allocation7]   ;;  %s1557_s28 = scalar_lea.hbm %s2049_s1, 12800 }
   0xf   : > { %s2057_s20 = scalar_select %p1784_p8, 1, 0 }
  0x10   : > { %p1493_p9 = pneg %p1784_p8  ;;  %s145_s25 = sshll.u32 %s1716_s24, 4  ;;  %s1796_s25 = int_to_ptr.vmem [resolvable:$true] %s145_s25 }
  0x11   : > { %p1558_p11 = scmp.ne.s32.totalorder %s2049_s1, %s1557_s28  ;;  %p1564_p3 = scmp.lt.u32.totalorder %s1557_s28, %s2049_s1 }
  0x12   : > { %p1792_p10 = pnand %p1493_p9, %p2052_p1 }
  0x14   : > { %p1559_p12 = pneg %p1792_p10 }
  0x16   : > { %p1560_p13 = pnand %p1559_p12, %p1558_p11 }
  0x18   : > { %p1561_p0 = pneg %p1560_p13 }
  0x1a   : > { %p1566_p5 = pnand %p1564_p3, %p1561_p0 }
  0x1c   : > { %1569 = shalt.err (!%p1566_p5)
}
  0x1d   : > { %s1570_s6 = scalar_lea.vmem %s132_s22, 12800  ;;  %p1578_p2 = scmp.lt.s32.totalorder %s132_s22, %s132_s22 }
  0x1e   : > { %p1571_p7 = scmp.ne.s32.totalorder %s132_s22, %s1570_s6  ;;  %p1579_p6 = scmp.lt.s32.totalorder %s1570_s6, %s1570_s6 }
  0x20   : > { %p1573_p9 = pnand %p1571_p7, %p1559_p12  ;;  %p1580_p4 = por %p1579_p6, %p1578_p2 }
  0x22   : > { %p1574_p1 = pneg %p1573_p9 }
  0x24   : > { %p1581_p8 = pnand %p1580_p4, %p1574_p1 }
  0x26   : > { %1584 = shalt.err (!%p1581_p8)
}
  0x27   : > { %s1717_s7 = smov 128   ;;  %s1718_s8 = smov 8  }
  0x28   : > { %1496 = dma.hbm_to_vmem [thread:$0]  (!%p1792_p10), %s2049_s1, 12800, %s132_s22, [#allocation6], %s1717_s7, %s1717_s7, %s1718_s8  }
  0x29   : > { %s1585_s21 = scalar_lea.hbm %s2050_s2, 128 }
  0x2a   : > { %p1586_p11 = scmp.ne.s32.totalorder %s2050_s2, %s1585_s21  ;;  %p1592_p4 = scmp.lt.u32.totalorder %s1585_s21, %s2050_s2 }
  0x2c   : > { %p1588_p1 = pnand %p1586_p11, %p1559_p12 }
  0x2e   : > { %p1589_p2 = pneg %p1588_p1 }
  0x30   : > { %p1594_p6 = pnand %p1592_p4, %p1589_p2 }
  0x32   : > { %1597 = shalt.err (!%p1594_p6)
}
  0x33   : > { %s1598_s22 = scalar_lea.vmem %s1796_s25, 128  ;;  %p1606_p3 = scmp.lt.s32.totalorder %s1796_s25, %s1796_s25 }
  0x34   : > { %p1599_p8 = scmp.ne.s32.totalorder %s1796_s25, %s1598_s22  ;;  %p1607_p5 = scmp.lt.s32.totalorder %s1598_s22, %s1598_s22 }
  0x36   : > { %p1601_p13 = pnand %p1599_p8, %p1559_p12  ;;  %p1608_p7 = por %p1607_p5, %p1606_p3 }
  0x38   : > { %p1602_p0 = pneg %p1601_p13 }
  0x3a   : > { %p1609_p9 = pnand %p1608_p7, %p1602_p0 }
  0x3c   : > { %1612 = shalt.err (!%p1609_p9)
}
  0x3d   : > { %1499 = dma.hbm_to_vmem [thread:$0]  (!%p1792_p10), %s2050_s2, 128, %s1796_s25, [#allocation6]  }
  0x3e   : > { %s1846_s4 = sadd.s32 1, %s1713_s15   ;;  %s27_s23 = sadd.s32 1, %s1709_s14 }
  0x3f   : > { %s24_s5 = ssub.s32 %s1713_s15, %s1846_s4  ;;  %p34_p12 = scmp.ne.s32.totalorder %s1709_s14, %s1705_s13 }
  0x40   : > { %p25_p11 = scmp.eq.s32.totalorder %s24_s5, 0  ;;  %p35_p1 = scmp.eq.s32.totalorder %s1713_s15, 0 }
  0x41   : > { %p2059_p2 = scmp.eq.s32.totalorder %s1765_s16, 2  ;;  %p1510_p6 = scmp.lt.s32.totalorder %s1713_s15, 3 }
  0x42   : > { %s1862_s7 = scalar_select %p25_p11, %s1709_s14, %s27_s23  }
  0x43   : > { %p1856_p4 = por %p2059_p2, %p34_p12  ;;  %p36_p8 = por %p35_p1, %p34_p12 }
  0x44   : > { %s156_s8 = sand.u32 1, %s1709_s14   ;;  %s984_s25 = sshll.u32 %s1713_s15, 7 }
  0x45   : > { %s983_s9 = sshll.u32 %s156_s8, 3  ;;  %s1869_s17 = scalar_lea.hbm %s2048_s0, %s984_s25 }
  0x46   : > { %s160_s21 = scalar_lea.vmem [#allocation2], %s983_s9  ;;  %p1873_p10 = pnand %p1510_p6, %p36_p8 }
  0x47   : > { %s167_s24 = sshll.u32 %s160_s21, 4  ;;  %s157_s27 = scalar_lea.sflag [#allocation3], %s156_s8  ;;  %s1871_s24 = int_to_ptr.vmem [resolvable:$true] %s167_s24 }
  0x48   : > { %s1613_s28 = scalar_lea.hbm %s1869_s17, 128  ;;  %p1615_p0 = pneg %p1873_p10 }
  0x49   : > { %p1614_p13 = scmp.ne.s32.totalorder %s1869_s17, %s1613_s28  ;;  %s1618_s30 = scalar_lea.hbm %s2048_s0, 384 }
  0x4a   : > { %p1619_p7 = scmp.lt.u32.totalorder %s1869_s17, %s2048_s0  ;;  %p1620_p9 = scmp.lt.u32.totalorder %s1618_s30, %s1613_s28 }
  0x4b   : > { %p1616_p3 = pnand %p1615_p0, %p1614_p13  ;;  %p1622_p11 = scmp.lt.u32.totalorder %s1613_s28, %s1869_s17 }
  0x4c   : > { %p1621_p12 = por %p1620_p9, %p1619_p7 }
  0x4d   : > { %p1617_p5 = pneg %p1616_p3 }
  0x4e   : > { %p1623_p1 = por %p1622_p11, %p1621_p12 }
  0x50   : > { %p1624_p2 = pnand %p1623_p1, %p1617_p5 }
  0x52   : > { %1627 = shalt.err (!%p1624_p2)
}
  0x53   : > { %s1628_s8 = scalar_lea.vmem %s1871_s24, 128  ;;  %s1719_s9 = smov [#allocation2]  }
  0x54   : > { %p1629_p6 = scmp.ne.s32.totalorder %s1871_s24, %s1628_s8  ;;  %s1633_s25 = sshll.u32 %s1719_s9, 4  ;;  %s1634_s25 = int_to_ptr.vmem [resolvable:$false] %s1633_s25 }
  0x55   : > { %s1635_s10 = scalar_lea.vmem %s1634_s25, 256  ;;  %p1636_p3 = scmp.lt.s32.totalorder %s1871_s24, %s1634_s25 }
  0x56   : > { %p1631_p8 = pnand %p1629_p6, %p1615_p0  ;;  %p1637_p7 = scmp.lt.s32.totalorder %s1635_s10, %s1628_s8 }
  0x58   : > { %p1632_p13 = pneg %p1631_p8  ;;  %p1638_p9 = por %p1637_p7, %p1636_p3 }
  0x5a   : > { %p1639_p12 = pnand %p1638_p9, %p1632_p13 }
  0x5c   : > { %1642 = shalt.err (!%p1639_p12)
}
  0x5d   : > { %1503 = dma.hbm_to_vmem [thread:$0]  (!%p1873_p10), %s1869_s17, 128, %s1871_s24, %s157_s27  }
  0x5e   : > { %p2062_p5 = scmp.ne.s32.totalorder %s2057_s20, 0 }
  0x5f   : > { %s1905_s11 = sand.u32 (!%p2062_p5), 1, %s1705_s13   ;;  %p2063_p0 = scmp.ne.s32.totalorder (!%p2062_p5), %s2055_s18, 0 }
  0x60   : > { %176 = sbr.rel (%p2062_p5) target bundleno = 1245 (0x4dd), region = 32  ;;  %s986_s21 = sshll.u32 (!%p2062_p5), %s1905_s11, 3 }
  0x61   : > { %s179_s28 = scalar_lea.sflag (!%p2062_p5), [#allocation3], %s1905_s11  ;;  %s1911_s22 = scalar_lea.vmem (!%p2062_p5), [#allocation2], %s986_s21 }
  0x67   : > { %1688 = dma.done.wait (%p2063_p0), %s179_s28, 128  }
  0x68   : > { %1690 = vsyncadd (%p2063_p0), %s179_s28, 4294967168  ;;  %p2064_p10 = scmp.eq.s32.totalorder %s1765_s16, 0 }
  0x6a   : > { %1692 = dma.done.wait (%p2064_p10), [#allocation6], 12928   ;;  %p2065_p11 = pmov %p2064_p10 }
  0x6b   : > { %v1720_v0 = vmov 0.0|0.0   ;;  %vm1721_vm0 = vmmov 0   ;;  %v1722_v1 = vmov 0.0   ;;  %v216_v2 = vld [vmem:[#allocation5] sm:$0xff]  ;;  %v217_v3 = vld [vmem:[#allocation5 + $0x8] sm:$0xff]  ;;  %v218_v4 = vld [vmem:[#allocation5 + $0x10] sm:$0xff]  ;;  %v214_v54 = vlaneseq }
  0x6c   : > { %1694 = vsyncadd (%p2065_p11), [#allocation6], 4294954368  ;;  %1331 = vmatprep.subr.bf16.mxu0 %v1720_v0  ;;  %1118 = vmatprep.mubr.msk.f32.mxu0 %vm1721_vm0, %v1722_v1  ;;  %v1332_v5 = vpack.c.bf16 %v217_v3, %v216_v2  ;;  %v219_v6 = vld [vmem:[#allocation5 + $0x18] sm:$0xff]  ;;  %v306_v7 = vld [vmem:[#allocation5 + $0x20] sm:$0xff]  ;;  %vm225_vm1 = vcmask 261120   ;;  %s1000_s18 = sshll.u32 %s1765_s16, 7 }
  0x6d   : > { %1337 = vmatprep.subr.bf16.mxu1 %v1720_v0  ;;  %1153 = vmatprep.mubr.msk.f32.mxu1 %vm1721_vm0, %v1722_v1  ;;  %v307_v8 = vld [vmem:[#allocation5 + $0x28] sm:$0xff]  ;;  %v308_v9 = vld [vmem:[#allocation5 + $0x30] sm:$0xff]  ;;  %v309_v10 = vld [vmem:[#allocation5 + $0x38] sm:$0xff]  ;;  %v1335_v11 = vpack.c.bf16 %v219_v6, %v218_v4  ;;  %v1947_v55 = vand.u32 127, %v214_v54  ;;  %s212_s20 = scalar_lea.vmem [#allocation8], %s986_s21  ;;  %s2005_s27 = scalar_lea.hbm %s2051_s3, %s1000_s18 }
  0x6e   : > { %1333 = vmatpush3.bf16.msra.mxu0 %v1332_v5  ;;  %v1338_v12 = vpack.c.bf16 %v307_v8, %v306_v7  ;;  %v1341_v13 = vpack.c.bf16 %v309_v10, %v308_v9  ;;  %v310_v14 = vld [vmem:[#allocation5 + $0x40] sm:$0xff]  ;;  %v311_v15 = vld [vmem:[#allocation5 + $0x48] sm:$0xff]  ;;  %v213_v16 = vld [vmem:[%s1911_s22] sm:$0xff]  ;;  %s889_s17 = sshll.u32 %s212_s20, 4  ;;  %s876_s16 = scalar_lea.sflag [#allocation4], %s1905_s11  ;;  %s2007_s17 = int_to_ptr.vmem [resolvable:$true] %s889_s17 }
  0x6f   : > { %1334 = vmatprep.subr.bf16.mxu0 %v1720_v0  ;;  %v1344_v17 = vpack.c.bf16 %v311_v15, %v310_v14  ;;  %v312_v18 = vld [vmem:[#allocation5 + $0x50] sm:$0xff]  ;;  %v313_v19 = vld [vmem:[#allocation5 + $0x58] sm:$0xff]  ;;  %v314_v21 = vld [vmem:[#allocation5 + $0x60] sm:$0xff]  ;;  %vm299_vm2 = vcmp.ge.s32.totalorder %v1947_v55, 32  ;;  %vm300_vm3 = vcmp.lt.s32.totalorder %v1947_v55, 64  ;;  %vm397_vm6 = vcmp.ge.s32.totalorder %v1947_v55, 8 }
  0x70   : > { %1339 = vmatpush3.bf16.msra.mxu1 %v1338_v12  ;;  %v1347_v20 = vpack.c.bf16 %v313_v19, %v312_v18  ;;  %v315_v22 = vld [vmem:[#allocation5 + $0x68] sm:$0xff]  ;;  %v316_v24 = vld [vmem:[#allocation5 + $0x70] sm:$0xff]  ;;  %v317_v25 = vld [vmem:[#allocation5 + $0x78] sm:$0xff]  ;;  %vm398_vm7 = vcmp.lt.s32.totalorder %v1947_v55, 16  ;;  %vm870_vm11 = vcmp.lt.s32.totalorder %v1947_v55, 32  ;;  %s1643_s29 = scalar_lea.vmem %s2007_s17, 128 }
  0x71   : > { %1340 = vmatprep.subr.bf16.mxu1 %v1720_v0  ;;  %v1350_v23 = vpack.c.bf16 %v315_v22, %v314_v21  ;;  %v1353_v26 = vpack.c.bf16 %v317_v25, %v316_v24  ;;  %v318_v27 = vld [vmem:[#allocation5 + $0x80] sm:$0xff]  ;;  %v319_v28 = vld [vmem:[#allocation5 + $0x88] sm:$0xff]  ;;  %v320_v30 = vld [vmem:[#allocation5 + $0x90] sm:$0xff]  ;;  %p1644_p1 = scmp.ne.s32.totalorder %s2007_s17, %s1643_s29  ;;  %s1723_s30 = smov [#allocation8]  }
  0x72   : > { %1336 = vmatpush3.bf16.msra.mxu0 %v1335_v11  ;;  %v1356_v29 = vpack.c.bf16 %v319_v28, %v318_v27  ;;  %v321_v31 = vld [vmem:[#allocation5 + $0x98] sm:$0xff]  ;;  %v404_v33 = vld [vmem:[#allocation5 + $0xa0] sm:$0xff]  ;;  %v405_v34 = vld [vmem:[#allocation5 + $0xa8] sm:$0xff]  ;;  %s1647_s23 = sshll.u32 %s1723_s30, 4  ;;  %s1648_s23 = int_to_ptr.vmem [resolvable:$false] %s1647_s23 }
  0x73   : > { %1361 = vmatprep.subr.bf16.mxu0 %v1720_v0  ;;  %v1359_v32 = vpack.c.bf16 %v321_v31, %v320_v30  ;;  %v406_v35 = vld [vmem:[#allocation5 + $0xb0] sm:$0xff]  ;;  %v1362_v36 = vpack.c.bf16 %v405_v34, %v404_v33  ;;  %v407_v37 = vld [vmem:[#allocation5 + $0xb8] sm:$0xff]  ;;  %v408_v39 = vld [vmem:[#allocation5 + $0xc0] sm:$0xff]  ;;  %p1645_p2 = pnand %p1644_p1, %p1856_p4  ;;  %s1649_s5 = scalar_lea.vmem %s1648_s23, 256 }
  0x74   : > { %1342 = vmatpush3.bf16.msra.mxu1 %v1341_v13  ;;  %v1365_v38 = vpack.c.bf16 %v407_v37, %v406_v35  ;;  %v409_v40 = vld [vmem:[#allocation5 + $0xc8] sm:$0xff]  ;;  %v410_v42 = vld [vmem:[#allocation5 + $0xd0] sm:$0xff]  ;;  %v411_v43 = vld [vmem:[#allocation5 + $0xd8] sm:$0xff]  ;;  %p1650_p8 = scmp.lt.s32.totalorder %s2007_s17, %s1648_s23  ;;  %p1651_p13 = scmp.lt.s32.totalorder %s1649_s5, %s1643_s29 }
  0x75   : > { %1119 = vmatmul.mubr.msk.f32.vlgmr.msra.gmra.mrb[0].mxu0 %vm225_vm1, %v213_v16  ;;  %1343 = vmatprep.subr.bf16.mxu1 %v1720_v0  ;;  %v1368_v41 = vpack.c.bf16 %v409_v40, %v408_v39  ;;  %v1371_v44 = vpack.c.bf16 %v411_v43, %v410_v42  ;;  %v412_v45 = vld [vmem:[#allocation5 + $0xe0] sm:$0xff]  ;;  %v413_v46 = vld [vmem:[#allocation5 + $0xe8] sm:$0xff]  ;;  %v414_v48 = vld [vmem:[#allocation5 + $0xf0] sm:$0xff]  ;;  %p1646_p6 = pneg %p1645_p2 }
  0x76   : > { %1188 = vmatprep.mubr.msk.f32.mxu0 %vm1721_vm0, %v1722_v1  ;;  %1363 = vmatpush3.bf16.msra.mxu0 %v1362_v36  ;;  %v1374_v47 = vpack.c.bf16 %v413_v46, %v412_v45  ;;  %v415_v49 = vld [vmem:[#allocation5 + $0xf8] sm:$0xff]  ;;  %v416_v51 = vld [vmem:[#allocation5 + $0x100] sm:$0xff]  ;;  %v417_v52 = vld [vmem:[#allocation5 + $0x108] sm:$0xff]  ;;  %p1652_p3 = por %p1651_p13, %p1650_p8 }
  0x77   : > { %1364 = vmatprep.subr.bf16.mxu0 %v1720_v0  ;;  %v1377_v50 = vpack.c.bf16 %v415_v49, %v414_v48  ;;  %v1380_v53 = vpack.c.bf16 %v417_v52, %v416_v51  ;;  %vm301_vm4 = vmand %vm299_vm2, %vm300_vm3  ;;  %v990_v56 = vld [vmem:[#allocation7] ss:$0 sm:$0xff]  ;;  %v418_v63 = vld [vmem:[#allocation5 + $0x110] sm:$0xff] }
  0x78   : > { %1345 = vmatpush3.bf16.msra.mxu1 %v1344_v17  ;;  %v1952_v58 = vsel %vm301_vm4, 0.1, %v1722_v1  ;;  %v419_v2 = vld [vmem:[#allocation5 + $0x118] sm:$0xff]  ;;  %v498_v4 = vld [vmem:[#allocation5 + $0x120] sm:$0xff]  ;;  %v499_v5 = vld [vmem:[#allocation5 + $0x128] sm:$0xff]  ;;  %p1653_p7 = pnand %p1652_p3, %p1646_p6 }
  0x79   : > { %1346 = vmatprep.subr.bf16.mxu1 %v1720_v0  ;;  %v1383_v3 = vpack.c.bf16 %v419_v2, %v418_v63  ;;  %v500_v6 = vld [vmem:[#allocation5 + $0x130] sm:$0xff]  ;;  %v1386_v7 = vpack.c.bf16 %v499_v5, %v498_v4  ;;  %v501_v8 = vld [vmem:[#allocation5 + $0x138] sm:$0xff]  ;;  %v502_v10 = vld [vmem:[#allocation5 + $0x140] sm:$0xff] }
  0x7a   : > { %1366 = vmatpush3.bf16.msra.mxu0 %v1365_v38  ;;  %v1389_v9 = vpack.c.bf16 %v501_v8, %v500_v6  ;;  %v503_v11 = vld [vmem:[#allocation5 + $0x148] sm:$0xff]  ;;  %v504_v13 = vld [vmem:[#allocation5 + $0x150] sm:$0xff]  ;;  %v505_v14 = vld [vmem:[#allocation5 + $0x158] sm:$0xff] }
  0x7b   : > { %1367 = vmatprep.subr.bf16.mxu0 %v1720_v0  ;;  %v1392_v12 = vpack.c.bf16 %v503_v11, %v502_v10  ;;  %v1395_v15 = vpack.c.bf16 %v505_v14, %v504_v13  ;;  %v506_v16 = vld [vmem:[#allocation5 + $0x160] sm:$0xff]  ;;  %v507_v17 = vld [vmem:[#allocation5 + $0x168] sm:$0xff]  ;;  %v508_v19 = vld [vmem:[#allocation5 + $0x170] sm:$0xff] }
  0x7c   : > { %1348 = vmatpush3.bf16.msra.mxu1 %v1347_v20  ;;  %v1398_v18 = vpack.c.bf16 %v507_v17, %v506_v16  ;;  %v509_v20 = vld [vmem:[#allocation5 + $0x178] sm:$0xff]  ;;  %v510_v22 = vld [vmem:[#allocation5 + $0x180] sm:$0xff]  ;;  %vm399_vm8 = vmand %vm397_vm6, %vm398_vm7 }
  0x7d   : > { %1349 = vmatprep.subr.bf16.mxu1 %v1720_v0  ;;  %v1401_v21 = vpack.c.bf16 %v509_v20, %v508_v19  ;;  %v992_v25 = vld [vmem:[#allocation7 + $0x1] ss:$0 sm:$0xff]  ;;  %v400_v27 = vsel %vm399_vm8, 0.1, %v1722_v1  ;;  %v597_v34 = vld [vmem:[#allocation5 + $0x1b0] sm:$0xff]  ;;  %v598_v35 = vld [vmem:[#allocation5 + $0x1b8] sm:$0xff] }
  0x7e   : > { %1369 = vmatpush3.bf16.msra.mxu0 %v1368_v41  ;;  %v595_v28 = vld [vmem:[#allocation5 + $0x1a0] sm:$0xff]  ;;  %v1413_v37 = vpack.c.bf16 %v598_v35, %v597_v34  ;;  %v600_v39 = vld [vmem:[#allocation5 + $0x1c8] sm:$0xff]  ;;  %v601_v41 = vld [vmem:[#allocation5 + $0x1d0] sm:$0xff] }
  0x7f   : > { %1370 = vmatprep.subr.bf16.mxu0 %v1720_v0  ;;  %v599_v38 = vld [vmem:[#allocation5 + $0x1c0] sm:$0xff]  ;;  %v602_v42 = vld [vmem:[#allocation5 + $0x1d8] sm:$0xff]  ;;  %v604_v45 = vld [vmem:[#allocation5 + $0x1e8] sm:$0xff] }
  0x80   : > { %1351 = vmatpush3.bf16.msra.mxu1 %v1350_v23  ;;  %v511_v23 = vld [vmem:[#allocation5 + $0x188] sm:$0xff]  ;;  %v1416_v40 = vpack.c.bf16 %v600_v39, %v599_v38  ;;  %v1419_v43 = vpack.c.bf16 %v602_v42, %v601_v41  ;;  %v606_v48 = vld [vmem:[#allocation5 + $0x1f8] sm:$0xff]  ;;  %v687_v63 = vld [vmem:[#allocation5 + $0x220] sm:$0xff] }
  0x81   : > { %1352 = vmatprep.subr.bf16.mxu1 %v1720_v0  ;;  %v1404_v24 = vpack.c.bf16 %v511_v23, %v510_v22  ;;  %v608_v51 = vld [vmem:[#allocation5 + $0x208] sm:$0xff]  ;;  %v610_v54 = vld [vmem:[#allocation5 + $0x218] sm:$0xff]  ;;  %v691_v11 = vld [vmem:[#allocation5 + $0x240] sm:$0xff] }
  0x82   : > { %1372 = vmatpush3.bf16.msra.mxu0 %v1371_v44  ;;  %v603_v44 = vld [vmem:[#allocation5 + $0x1e0] sm:$0xff]  ;;  %v688_v2 = vld [vmem:[#allocation5 + $0x228] sm:$0xff]  ;;  %v690_v8 = vld [vmem:[#allocation5 + $0x238] sm:$0xff] }
  0x83   : > { %1373 = vmatprep.subr.bf16.mxu0 %v1720_v0  ;;  %v1422_v46 = vpack.c.bf16 %v604_v45, %v603_v44  ;;  %v1434_v6 = vpack.c.bf16 %v688_v2, %v687_v63  ;;  %v693_v14 = vld [vmem:[#allocation5 + $0x250] sm:$0xff]  ;;  %v695_v16 = vld [vmem:[#allocation5 + $0x260] sm:$0xff]  ;;  %v696_v17 = vld [vmem:[#allocation5 + $0x268] sm:$0xff] }
  0x84   : > { %1354 = vmatpush3.bf16.msra.mxu1 %v1353_v26  ;;  %v698_v19 = vld [vmem:[#allocation5 + $0x278] sm:$0xff]  ;;  %v700_v22 = vld [vmem:[#allocation5 + $0x288] sm:$0xff]  ;;  %v781_v35 = vld [vmem:[#allocation5 + $0x2b0] sm:$0xff] }
  0x85   : > { %1355 = vmatprep.subr.bf16.mxu1 %v1720_v0  ;;  %v783_v38 = vld [vmem:[#allocation5 + $0x2c0] sm:$0xff]  ;;  %v784_v39 = vld [vmem:[#allocation5 + $0x2c8] sm:$0xff]  ;;  %v785_v41 = vld [vmem:[#allocation5 + $0x2d0] sm:$0xff] }
  0x86   : > { %1375 = vmatpush3.bf16.msra.mxu0 %v1374_v47  ;;  %v605_v47 = vld [vmem:[#allocation5 + $0x1f0] sm:$0xff]  ;;  %v786_v42 = vld [vmem:[#allocation5 + $0x2d8] sm:$0xff]  ;;  %v787_v44 = vld [vmem:[#allocation5 + $0x2e0] sm:$0xff] }
  0x87   : > { %1376 = vmatprep.subr.bf16.mxu0 %v1720_v0  ;;  %v1425_v49 = vpack.c.bf16 %v606_v48, %v605_v47  ;;  %v788_v45 = vld [vmem:[#allocation5 + $0x2e8] sm:$0xff]  ;;  %v789_v47 = vld [vmem:[#allocation5 + $0x2f0] sm:$0xff]  ;;  %v790_v48 = vld [vmem:[#allocation5 + $0x2f8] sm:$0xff] }
  0x88   : > { %1357 = vmatpush3.bf16.msra.mxu1 %v1356_v29  ;;  %v596_v29 = vld [vmem:[#allocation5 + $0x1a8] sm:$0xff] }
  0x89   : > { %1358 = vmatprep.subr.bf16.mxu1 %v1720_v0  ;;  %v1410_v33 = vpack.c.bf16 %v596_v29, %v595_v28 }
  0x8a   : > { %1378 = vmatpush3.bf16.msra.mxu0 %v1377_v50  ;;  %v607_v50 = vld [vmem:[#allocation5 + $0x200] sm:$0xff] }
  0x8b   : > { %1379 = vmatprep.subr.bf16.mxu0 %v1720_v0  ;;  %v1428_v52 = vpack.c.bf16 %v608_v51, %v607_v50  ;;  %v791_v50 = vld [vmem:[#allocation5 + $0x300] sm:$0xff]  ;;  %v792_v51 = vld [vmem:[#allocation5 + $0x308] sm:$0xff] }
  0x8c   : > { %1360 = vmatpush3.bf16.msra.mxu1 %v1359_v32 }
  0x8d   : > { %1385 = vmatprep.subr.bf16.mxu1 %v1720_v0 }
  0x8e   : > { %1381 = vmatpush3.bf16.msra.mxu0 %v1380_v53  ;;  %v609_v53 = vld [vmem:[#allocation5 + $0x210] sm:$0xff] }
  0x8f   : > { %1382 = vmatprep.subr.bf16.mxu0 %v1720_v0 }
  0x92   : > { %1384 = vmatpush3.bf16.msra.mxu0 %v1383_v3 }
  0x93   : > { %1409 = vmatprep.subr.bf16.mxu0 %v1720_v0 }
 0x148   : > { %v295_v57 = vpop.f32.mrb[0].mxu0 }
 0x149   : > { %v296_v59 = vadd.f32 %v990_v56, %v295_v57  ;;  %v1120_v60 = vpop.f32.mrb[1].mxu0  ;;  %v1431_v56 = vpack.c.bf16 %v610_v54, %v609_v53  ;;  %v512_v57 = vld [vmem:[#allocation5 + $0x190] sm:$0xff]  ;;  %v794_v54 = vld [vmem:[#allocation5 + $0x318] sm:$0xff] }
 0x14a   : > { %v793_v53 = vld [vmem:[#allocation5 + $0x310] sm:$0xff] }
 0x14b   : > { %v304_v61 = vmul.f32 %v1952_v58, %v296_v59  ;;  %vm303_vm5 = vcmp.ge.f32.partialorder %v296_v59, 0.0 }
 0x14d   : > { %v305_v62 = vsel %vm303_vm5, %v296_v59, %v304_v61  ;;  %v513_v59 = vld [vmem:[#allocation5 + $0x198] sm:$0xff]  ;;  %v993_v61 = vld [vmem:[#allocation7 + $0x2] ss:$0 sm:$0xff] }
 0x14e   : > { %1154 = vmatmul.mubr.f32.vlgmr.msra.gmra.mrb[0].mxu1 %v305_v62  ;;  %v1407_v60 = vpack.c.bf16 %v513_v59, %v512_v57 }
 0x14f   : > { %1223 = vmatprep.mubr.msk.f32.mxu1 %vm1721_vm0, %v1722_v1  ;;  %1387 = vmatpush3.bf16.msra.mxu1 %v1386_v7  ;;  %v689_v7 = vld [vmem:[#allocation5 + $0x230] sm:$0xff] }
 0x150   : > { %1388 = vmatprep.subr.bf16.mxu1 %v1720_v0  ;;  %v1437_v10 = vpack.c.bf16 %v690_v8, %v689_v7  ;;  %v998_v7 = vld [vmem:[#allocation7 + $0x6] ss:$0 sm:$0xff] }
 0x153   : > { %1390 = vmatpush3.bf16.msra.mxu1 %v1389_v9 }
 0x154   : > { %1391 = vmatprep.subr.bf16.mxu1 %v1720_v0 }
 0x157   : > { %1393 = vmatpush3.bf16.msra.mxu1 %v1392_v12  ;;  %v692_v12 = vld [vmem:[#allocation5 + $0x248] sm:$0xff] }
 0x158   : > { %1394 = vmatprep.subr.bf16.mxu1 %v1720_v0  ;;  %v1440_v13 = vpack.c.bf16 %v692_v12, %v691_v11 }
 0x15b   : > { %1396 = vmatpush3.bf16.msra.mxu1 %v1395_v15 }
 0x15c   : > { %1397 = vmatprep.subr.bf16.mxu1 %v1720_v0 }
 0x15f   : > { %1399 = vmatpush3.bf16.msra.mxu1 %v1398_v18  ;;  %v1446_v18 = vpack.c.bf16 %v696_v17, %v695_v16 }
 0x160   : > { %1400 = vmatprep.subr.bf16.mxu1 %v1720_v0 }
 0x163   : > { %1402 = vmatpush3.bf16.msra.mxu1 %v1401_v21  ;;  %v699_v21 = vld [vmem:[#allocation5 + $0x280] sm:$0xff] }
 0x164   : > { %1403 = vmatprep.subr.bf16.mxu1 %v1720_v0  ;;  %v1452_v23 = vpack.c.bf16 %v700_v22, %v699_v21 }
 0x167   : > { %1405 = vmatpush3.bf16.msra.mxu1 %v1404_v24  ;;  %v701_v24 = vld [vmem:[#allocation5 + $0x290] sm:$0xff] }
 0x168   : > { %1406 = vmatprep.subr.bf16.mxu1 %v1720_v0 }
 0x16b   : > { %1408 = vmatpush3.bf16.msra.mxu1 %v1407_v60  ;;  %v997_v60 = vld [vmem:[#allocation7 + $0x5] ss:$0 sm:$0xff] }
 0x16c   : > { %1433 = vmatprep.subr.bf16.mxu1 %v1720_v0 }
 0x221   : > { %v393_v26 = vpop.f32.mrb[0].mxu1 }
 0x222   : > { %v394_v30 = vadd.f32 %v992_v25, %v393_v26  ;;  %v1155_v31 = vpop.f32.mrb[1].mxu1  ;;  %v702_v25 = vld [vmem:[#allocation5 + $0x298] sm:$0xff]  ;;  %v996_v26 = vld [vmem:[#allocation7 + $0x4] ss:$0 sm:$0xff] }
 0x224   : > { %vm401_vm9 = vcmp.ge.f32.partialorder %v394_v30, 0.0  ;;  %v402_v32 = vmul.f32 %v400_v27, %v394_v30  ;;  %v1455_v27 = vpack.c.bf16 %v702_v25, %v701_v24 }
 0x226   : > { %v403_v36 = vsel %vm401_vm9, %v394_v30, %v402_v32  ;;  %v779_v32 = vld [vmem:[#allocation5 + $0x2a0] sm:$0xff] }
 0x227   : > { %1189 = vmatmul.mubr.f32.vlgmr.msra.gmra.mrb[2].mxu0 %v403_v36 }
 0x228   : > { %1411 = vmatpush3.bf16.msra.mxu0 %v1410_v33  ;;  %1258 = vmatprep.mubr.msk.f32.mxu0 %vm1721_vm0, %v1722_v1  ;;  %v780_v33 = vld [vmem:[#allocation5 + $0x2a8] sm:$0xff] }
 0x229   : > { %1412 = vmatprep.subr.bf16.mxu0 %v1720_v0  ;;  %v1458_v34 = vpack.c.bf16 %v780_v33, %v779_v32 }
 0x22c   : > { %1414 = vmatpush3.bf16.msra.mxu0 %v1413_v37 }
 0x22d   : > { %1415 = vmatprep.subr.bf16.mxu0 %v1720_v0 }
 0x230   : > { %1417 = vmatpush3.bf16.msra.mxu0 %v1416_v40  ;;  %v1464_v40 = vpack.c.bf16 %v784_v39, %v783_v38 }
 0x231   : > { %1418 = vmatprep.subr.bf16.mxu0 %v1720_v0 }
 0x234   : > { %1420 = vmatpush3.bf16.msra.mxu0 %v1419_v43  ;;  %v1467_v43 = vpack.c.bf16 %v786_v42, %v785_v41 }
 0x235   : > { %1421 = vmatprep.subr.bf16.mxu0 %v1720_v0 }
 0x238   : > { %1423 = vmatpush3.bf16.msra.mxu0 %v1422_v46  ;;  %v1470_v46 = vpack.c.bf16 %v788_v45, %v787_v44 }
 0x239   : > { %1424 = vmatprep.subr.bf16.mxu0 %v1720_v0 }
 0x23c   : > { %1426 = vmatpush3.bf16.msra.mxu0 %v1425_v49  ;;  %v1473_v49 = vpack.c.bf16 %v790_v48, %v789_v47 }
 0x23d   : > { %1427 = vmatprep.subr.bf16.mxu0 %v1720_v0 }
 0x240   : > { %1429 = vmatpush3.bf16.msra.mxu0 %v1428_v52  ;;  %v1476_v52 = vpack.c.bf16 %v792_v51, %v791_v50 }
 0x241   : > { %1430 = vmatprep.subr.bf16.mxu0 %v1720_v0 }
 0x244   : > { %1432 = vmatpush3.bf16.msra.mxu0 %v1431_v56  ;;  %v1479_v56 = vpack.c.bf16 %v794_v54, %v793_v53 }
 0x245   : > { %1457 = vmatprep.subr.bf16.mxu0 %v1720_v0 }
 0x247   : > { %1259 = vmatmul.mubr.f32.vlgmr.msra.gmra.mrb[4].mxu0 %v403_v36  ;;  %v782_v36 = vld [vmem:[#allocation5 + $0x2b8] sm:$0xff] }
 0x248   : > { %1328 = vmatprep.mubr.msk.f32.mxu0 %vm1721_vm0, %v1722_v1  ;;  %1459 = vmatpush3.bf16.msra.mxu0 %v1458_v34  ;;  %v1461_v37 = vpack.c.bf16 %v782_v36, %v781_v35 }
 0x249   : > { %1460 = vmatprep.subr.bf16.mxu0 %v1720_v0 }
 0x24c   : > { %1462 = vmatpush3.bf16.msra.mxu0 %v1461_v37 }
 0x24d   : > { %1463 = vmatprep.subr.bf16.mxu0 %v1720_v0 }
 0x250   : > { %1465 = vmatpush3.bf16.msra.mxu0 %v1464_v40 }
 0x251   : > { %1466 = vmatprep.subr.bf16.mxu0 %v1720_v0 }
 0x254   : > { %1468 = vmatpush3.bf16.msra.mxu0 %v1467_v43 }
 0x255   : > { %1469 = vmatprep.subr.bf16.mxu0 %v1720_v0 }
 0x258   : > { %1471 = vmatpush3.bf16.msra.mxu0 %v1470_v46 }
 0x259   : > { %1472 = vmatprep.subr.bf16.mxu0 %v1720_v0 }
 0x25c   : > { %1474 = vmatpush3.bf16.msra.mxu0 %v1473_v49 }
 0x25d   : > { %1475 = vmatprep.subr.bf16.mxu0 %v1720_v0 }
 0x260   : > { %1477 = vmatpush3.bf16.msra.mxu0 %v1476_v52 }
 0x261   : > { %1478 = vmatprep.subr.bf16.mxu0 %v1720_v0 }
 0x264   : > { %1480 = vmatpush3.bf16.msra.mxu0 %v1479_v56 }
 0x2fa   : > { %v491_v62 = vpop.f32.mrb[2].mxu0 }
 0x2fb   : > { %v492_v3 = vadd.f32 %v993_v61, %v491_v62  ;;  %v1190_v4 = vpop.f32.mrb[3].mxu0 }
 0x2fd   : > { %vm495_vm10 = vcmp.ge.f32.partialorder %v492_v3, 0.0  ;;  %v496_v5 = vmul.f32 %v492_v3, %v1952_v58  ;;  %v694_v58 = vld [vmem:[#allocation5 + $0x258] sm:$0xff] }
 0x2fe   : > { %v1443_v15 = vpack.c.bf16 %v694_v58, %v693_v14 }
 0x2ff   : > { %v497_v9 = vsel %vm495_vm10, %v492_v3, %v496_v5  ;;  %v994_v3 = vld [vmem:[#allocation7 + $0x3] ss:$0 sm:$0xff] }
 0x300   : > { %1224 = vmatmul.mubr.f32.vlgmr.msra.gmra.mrb[2].mxu1 %v497_v9 }
 0x301   : > { %1435 = vmatpush3.bf16.msra.mxu1 %v1434_v6  ;;  %1293 = vmatprep.mubr.msk.f32.mxu1 %vm1721_vm0, %v1722_v1  ;;  %v697_v1 = vld [vmem:[#allocation5 + $0x270] sm:$0xff] }
 0x302   : > { %1436 = vmatprep.subr.bf16.mxu1 %v1720_v0  ;;  %v1449_v20 = vpack.c.bf16 %v698_v19, %v697_v1 }
 0x305   : > { %1438 = vmatpush3.bf16.msra.mxu1 %v1437_v10 }
 0x306   : > { %1439 = vmatprep.subr.bf16.mxu1 %v1720_v0 }
 0x309   : > { %1441 = vmatpush3.bf16.msra.mxu1 %v1440_v13 }
 0x30a   : > { %1442 = vmatprep.subr.bf16.mxu1 %v1720_v0 }
 0x30d   : > { %1444 = vmatpush3.bf16.msra.mxu1 %v1443_v15 }
 0x30e   : > { %1445 = vmatprep.subr.bf16.mxu1 %v1720_v0 }
 0x311   : > { %1447 = vmatpush3.bf16.msra.mxu1 %v1446_v18 }
 0x312   : > { %1448 = vmatprep.subr.bf16.mxu1 %v1720_v0 }
 0x315   : > { %1450 = vmatpush3.bf16.msra.mxu1 %v1449_v20 }
 0x316   : > { %1451 = vmatprep.subr.bf16.mxu1 %v1720_v0 }
 0x319   : > { %1453 = vmatpush3.bf16.msra.mxu1 %v1452_v23 }
 0x31a   : > { %v682_v28 = vpop.f32.mrb[4].mxu0  ;;  %1454 = vmatprep.subr.bf16.mxu1 %v1720_v0 }
 0x31b   : > { %v683_v29 = vadd.f32 %v996_v26, %v682_v28  ;;  %v1260_v30 = vpop.f32.mrb[5].mxu0 }
 0x31d   : > { %v686_v31 = vmax.f32 %v683_v29, 0.0  ;;  %1456 = vmatpush3.bf16.msra.mxu1 %v1455_v27 }
 0x320   : > { %1294 = vmatmul.mubr.f32.vlgmr.msra.gmra.mrb[4].mxu1 %v686_v31 }
 0x3d3   : > { %v585_v57 = vpop.f32.mrb[2].mxu1 }
 0x3d4   : > { %v1225_v59 = vpop.f32.mrb[3].mxu1  ;;  %v586_v4 = vadd.f32 %v994_v3, %v585_v57 }
 0x3d6   : > { %v995_v5 = vmul.f32 -1.442695, %v586_v4 }
 0x3d8   : > { %1553 = vpow2.f32 %v995_v5 }
 0x3e2   : > { %v1554_v6 = vpop.eup %1553 }
 0x3e3   : > { %v592_v0 = vadd.f32 1.0, %v1554_v6 }
 0x3e5   : > { %1555 = vrcp.f32 %v592_v0 }
 0x3ef   : > { %v1556_v11 = vpop.eup %1555 }
 0x3f3   : > { %v774_v61 = vpop.f32.mrb[4].mxu1 }
 0x3f4   : > { %v775_v62 = vadd.f32 %v997_v60, %v774_v61  ;;  %v1295_v63 = vpop.f32.mrb[5].mxu1 }
 0x3f6   : > { %v778_v2 = vmax.f32 %v775_v62, 0.0 }
 0x3f8   : > { %1329 = vmatmul.mubr.f32.vlgmr.msra.gmra.mrb[6].mxu0 %v778_v2 }
 0x4cb   : > { %v866_v8 = vpop.f32.mrb[6].mxu0 }
 0x4cc   : > { %v867_v9 = vadd.f32 %v998_v7, %v866_v8  ;;  %v1330_v10 = vpop.f32.mrb[7].mxu0 }
 0x4ce   : > { %v873_v12 = vsel %vm870_vm11, %v1556_v11, %v867_v9 }
 0x4cf   : > { %874 = vst [vmem:[%s212_s20] sm:$0xff] %v873_v12 }
 0x4d0   : > { %1656 = shalt.err (!%p1653_p7)
}
 0x4d1   : > { %s1657_s8 = scalar_lea.hbm %s2005_s27, 128  ;;  %s1661_s10 = scalar_lea.hbm %s2051_s3, 384 }
 0x4d2   : > { %p1658_p9 = scmp.ne.s32.totalorder %s2005_s27, %s1657_s8  ;;  %p1662_p0 = scmp.lt.u32.totalorder %s2005_s27, %s2051_s3 }
 0x4d3   : > { %p1663_p10 = scmp.lt.u32.totalorder %s1661_s10, %s1657_s8  ;;  %p1665_p1 = scmp.lt.u32.totalorder %s1657_s8, %s2005_s27 }
 0x4d4   : > { %p1659_p12 = pnand %p1658_p9, %p1856_p4 }
 0x4d5   : > { %p1664_p11 = por %p1663_p10, %p1662_p0 }
 0x4d6   : > { %p1660_p5 = pneg %p1659_p12 }
 0x4d7   : > { %p1666_p2 = por %p1665_p1, %p1664_p11 }
 0x4d9   : > { %p1667_p6 = pnand %p1666_p2, %p1660_p5 }
 0x4db   : > { %1670 = shalt.err (!%p1667_p6)
}
 0x4dc   : > { %1491 = dma.vmem_to_hbm [thread:$0]  (%p1856_p4), %s2007_s17, 128, %s2005_s27, %s876_s16  }
 0x4dd PF: > { %p1513_p8 = scmp.ge.s32.totalorder %s1713_s15, 2  ;;  %s901_s28 = sand.u32 1, %s1701_s12  }
 0x4de   : > { %p2066_p13 = scmp.ne.s32.totalorder %s2056_s19, 0  ;;  %s902_s22 = scalar_lea.sflag [#allocation4], %s901_s28 }
 0x4e0   : > { %p1505_p3 = pnand %p1513_p8, %p2066_p13 }
 0x4e2   : > { %1696 = dma.done.wait (!%p1505_p3), %s902_s22, 128  }
 0x4e3   : > { %1698 = vsyncadd (!%p1505_p3), %s902_s22, 4294967168  ;;  %p17_p7 = scmp.ge.s32.totalorder %s1846_s4, 5   ;;  %s2067_s12 = smov %s1705_s13 }
 0x4e4   : > { %s2068_s13 = smov %s1709_s14  ;;  %s2069_s14 = smov %s1862_s7 }
 0x4e5   : > { %s2070_s15 = smov %s1846_s4  ;;  %19 = sbr.rel (!%p17_p7) target bundleno = 6 (0x6), region = 85 }
 0x4ec   :  { %907 = vsyncpa [#allocation3], 1 }
 0x4ed   :  { %909 = vsyncpa [#allocation3 + $0x1], 1 }
 0x4ee   :  { %910 = vsyncpa [#allocation6], 1 }
 0x4ef   :  { %911 = vsyncpa [#allocation4], 1 }
 0x4f0   :  { %913 = vsyncpa [#allocation4 + $0x1], 1 }

</bundles_post_ra>
